<compile_context>
chip_gen: v5e
topology: v5e:2x2
jax: 0.10.0
libtpu: 0.0.40
codegen_flags: <defaults>
</compile_context>

<pallas_src>
import numpy as np
import jax
import jax.numpy as jnp
from jax import lax
from jax.experimental import pallas as pl
from jax.experimental.pallas import tpu as pltpu


def sgcn_fused_kernel(label_ref, adj_ref, x_ref, w0_ref, b01_ref, w1_ref, o_ref):
    cdt = adj_ref.dtype                 # bf16 compute dtype for MXU operands
    n = adj_ref.shape[0]
    l = label_ref.shape[0]

    def leaky_relu(v):                  # negative_slope=0.2 (matches GraphConv)
        return jnp.where(v > 0, v, 0.2 * v)

    def l2_normalize(v):
        # F.normalize(p=2, dim=1, eps=1e-12):
        #   v / max(||v||, 1e-12)  ==  v * rsqrt(max(sum(v^2), 1e-24))  (EUP rsqrt)
        ss = jnp.sum(v * v, axis=-1, keepdims=True)
        return v * lax.rsqrt(jnp.maximum(ss, 1e-24))

    b01 = b01_ref[...]                  # (2, Hp) f32
    b0 = b01[0:1, :]
    b1 = b01[1:2, :]

    # ---- Layer 1 over all N nodes (layer 2 needs every node's hidden state).
    xw = jnp.dot(x_ref[...], w0_ref[...], preferred_element_type=jnp.float32)
    h = jnp.dot(adj_ref[...], xw.astype(cdt),
                preferred_element_type=jnp.float32) + b0
    h = l2_normalize(leaky_relu(h))     # (N, Hp) f32

    # ---- In-kernel selection of the L label rows of adj via a one-hot matmul
    #      (label_idx read from SMEM; exact row extraction since sel is 0/1).
    row_id = lax.broadcasted_iota(jnp.int32, (l, n), 0)
    col_id = lax.broadcasted_iota(jnp.int32, (l, n), 1)
    lab = jnp.zeros((l, n), jnp.int32)
    for i in range(l):                  # L is small & static -> unrolled
        lab = jnp.where(row_id == i, label_ref[i], lab)
    sel = jnp.where(col_id == lab, 1.0, 0.0).astype(cdt)          # (L, N)
    adj_sel = jnp.dot(sel, adj_ref[...],
                      preferred_element_type=jnp.float32)         # (L, N)

    # ---- Layer 2 restricted to the label rows: (adj[label] @ h) @ w1 + b1.
    hs = jnp.dot(adj_sel.astype(cdt), h.astype(cdt),
                 preferred_element_type=jnp.float32)              # (L, Hp)
    h2 = jnp.dot(hs.astype(cdt), w1_ref[...],
                 preferred_element_type=jnp.float32) + b1         # (L, Hp)
    o_ref[...] = l2_normalize(leaky_relu(h2)).astype(o_ref.dtype)


def _round_up(x, m):
    return ((x + m - 1) // m) * m


def prepare_sgcn_params(adj, feat, params, *, compute_dtype=jnp.bfloat16):
    """One-time operand prep, hoisted OUT of the per-call hot path:
       pad K (300->384) and H (64->128) with zeros, fold b0/b1 into one (2,Hp)
       f32 array, cast MXU operands (adj, feat, w0, w1) to bf16."""
    (w0, b0), (w1, b1) = params
    f_in, h = w0.shape
    f_pad = _round_up(f_in, 128)
    h_pad = _round_up(h, 128)

    w0p = jnp.zeros((f_pad, h_pad), compute_dtype).at[:f_in, :h].set(
        w0.astype(compute_dtype))
    w1p = jnp.zeros((h_pad, h_pad), compute_dtype).at[:h, :h].set(
        w1.astype(compute_dtype))
    b01 = jnp.zeros((2, h_pad), jnp.float32).at[0, :h].set(b0).at[1, :h].set(b1)
    featp = jnp.zeros((feat.shape[0], f_pad), compute_dtype).at[:, :f_in].set(
        feat.astype(compute_dtype))
    adjp = adj.astype(compute_dtype)
    return adjp, featp, w0p, b01, w1p, h


def sgcn_forward(adj, feat, w0, b01, w1, label_idx, *, out_dim):
    """Fused 2-layer SGCN forward on pre-prepared operands. Returns (L, out_dim)."""
    n = adj.shape[0]
    f_pad = feat.shape[1]
    h_pad = w1.shape[1]
    l = label_idx.shape[0]

    flops = 2 * (n * f_pad * h_pad      # x @ w0
                 + n * n * h_pad        # adj @ (x w0)
                 + l * n * n            # one-hot row select
                 + l * n * h_pad        # adj[label] @ h
                 + l * h_pad * h_pad)   # (.) @ w1
    bytes_accessed = sum(int(np.prod(a.shape)) * a.dtype.itemsize
                         for a in (label_idx, adj, feat, w0, b01, w1))
    bytes_accessed += l * h_pad * 4     # output

    vmem = lambda: pl.BlockSpec(memory_space=pltpu.MemorySpace.VMEM)
    smem = lambda: pl.BlockSpec(memory_space=pltpu.MemorySpace.SMEM)

    out = pl.pallas_call(
        sgcn_fused_kernel,
        out_shape=jax.ShapeDtypeStruct((l, h_pad), jnp.float32),
        in_specs=[smem(), vmem(), vmem(), vmem(), vmem(), vmem()],
        out_specs=vmem(),
        cost_estimate=pl.CostEstimate(
            flops=int(flops),
            transcendentals=int(n + l),            # one rsqrt per normalized row
            bytes_accessed=int(bytes_accessed)),
    )(label_idx, adj, feat, w0, b01, w1)
    return out[:, :out_dim]


def xavier_uniform(key, shape):
    fan_in, fan_out = shape
    limit = float(np.sqrt(6.0 / (fan_in + fan_out)))
    return jax.random.uniform(key, shape, jnp.float32, -limit, limit)


def build_adj(key, n):
    # Random directed edges -> dense adjacency, row-normalized ("in"-degree),
    # mirroring normt_spm(adj, method='in') on a coo matrix of ones.
    a = (jax.random.uniform(key, (n, n)) < 0.3).astype(jnp.float32)
    a = a.at[jnp.arange(n), jnp.arange(n)].set(1.0)  # ensure nonzero rows
    deg = jnp.sum(a, axis=1, keepdims=True)
    return a / deg


if __name__ == "__main__":
    key = jax.random.PRNGKey(0)
    k_adj, k_feat, k_w0, k_w1 = jax.random.split(key, 4)

    n = 16          # number of graph nodes
    in_dim = 300    # GraphConv(300, 64)
    hid_dim = 64    # GraphConv(64, 64)

    adj = build_adj(k_adj, n)                                    # (16, 16)
    feat = jax.random.normal(k_feat, (n, in_dim), jnp.float32)   # (16, 300)

    params = [
        (xavier_uniform(k_w0, (in_dim, hid_dim)), jnp.zeros((hid_dim,), jnp.float32)),
        (xavier_uniform(k_w1, (hid_dim, hid_dim)), jnp.zeros((hid_dim,), jnp.float32)),
    ]
    label_idx = jnp.array([2, 5, 7], dtype=jnp.int32)

    # One-time prep (pads, bias fold, bf16 casts) -- outside the jitted forward.
    adj_p, feat_p, w0_p, b01_p, w1_p, h = prepare_sgcn_params(adj, feat, params)
    jax.block_until_ready((adj_p, feat_p, w0_p, b01_p, w1_p))

    fwd = jax.jit(sgcn_forward, static_argnames=("out_dim",))
    out = fwd(adj_p, feat_p, w0_p, b01_p, w1_p, label_idx, out_dim=hid_dim)  # (3, 64)
    jax.block_until_ready(out)

    # Sanity check against a pure-JAX f32 reference (unpadded, unfused).
    # bf16 MXU operands => relaxed tolerance.
    def ref_layer(a, x, w, b):
        hh = a @ (x @ w) + b
        hh = jnp.where(hh > 0, hh, 0.2 * hh)
        nrm = jnp.maximum(jnp.linalg.norm(hh, axis=1, keepdims=True), 1e-12)
        return hh / nrm

    xr = feat
    for (w, b) in params:
        xr = ref_layer(adj, xr, w, b)
    ref = xr[label_idx]
    np.testing.assert_allclose(np.asarray(out), np.asarray(ref), rtol=2e-2, atol=2e-2)

    print("KERNEL_OK")
</pallas_src>

<mosaic_0001>
module attributes {stable_mosaic.version = 11 : i64} {
  func.func @sgcn_fused_kernel(%arg0: memref<3xi32, #tpu.memory_space<smem>>, %arg1: memref<16x16xbf16, #tpu.memory_space<vmem>>, %arg2: memref<16x384xbf16, #tpu.memory_space<vmem>>, %arg3: memref<384x128xbf16, #tpu.memory_space<vmem>>, %arg4: memref<2x128xf32, #tpu.memory_space<vmem>>, %arg5: memref<128x128xbf16, #tpu.memory_space<vmem>>, %arg6: memref<3x128xf32, #tpu.memory_space<vmem>>) attributes {dimension_semantics = [], scalar_prefetch = 0 : i64, scratch_operands = 0 : i64, tpu.core_type = #tpu.core_type<tc>} {
    %c0 = arith.constant 0 : index
    %c0_0 = arith.constant 0 : index
    %0 = vector.load %arg4[%c0, %c0_0] : memref<2x128xf32, #tpu.memory_space<vmem>>, vector<2x128xf32>
    %1 = vector.extract_strided_slice %0 {offsets = [0, 0], sizes = [1, 128], strides = [1, 1]} : vector<2x128xf32> to vector<1x128xf32>
    %2 = vector.extract_strided_slice %0 {offsets = [1, 0], sizes = [1, 128], strides = [1, 1]} : vector<2x128xf32> to vector<1x128xf32>
    %c0_1 = arith.constant 0 : index
    %c0_2 = arith.constant 0 : index
    %3 = vector.load %arg2[%c0_1, %c0_2] : memref<16x384xbf16, #tpu.memory_space<vmem>>, vector<16x384xbf16>
    %c0_3 = arith.constant 0 : index
    %c0_4 = arith.constant 0 : index
    %4 = vector.load %arg3[%c0_3, %c0_4] : memref<384x128xbf16, #tpu.memory_space<vmem>>, vector<384x128xbf16>
    %cst = arith.constant dense<0.000000e+00> : vector<16x128xf32>
    %5 = tpu.matmul %3, %4, %cst {dimension_numbers = #tpu.dot_dimension_numbers<[1], [0], [0], [1], [0, 0, 1, 1], [], []>} : vector<16x384xbf16>, vector<384x128xbf16>, vector<16x128xf32> -> vector<16x128xf32>
    %c0_5 = arith.constant 0 : index
    %c0_6 = arith.constant 0 : index
    %6 = vector.load %arg1[%c0_5, %c0_6] : memref<16x16xbf16, #tpu.memory_space<vmem>>, vector<16x16xbf16>
    %7 = arith.truncf %5 : vector<16x128xf32> to vector<16x128xbf16>
    %cst_7 = arith.constant dense<0.000000e+00> : vector<16x128xf32>
    %8 = tpu.matmul %6, %7, %cst_7 {dimension_numbers = #tpu.dot_dimension_numbers<[1], [0], [0], [1], [0, 0, 1, 1], [], []>} : vector<16x16xbf16>, vector<16x128xbf16>, vector<16x128xf32> -> vector<16x128xf32>
    %9 = vector.broadcast %1 : vector<1x128xf32> to vector<16x128xf32>
    %10 = arith.addf %8, %9 : vector<16x128xf32>
    %cst_8 = arith.constant 0.000000e+00 : f32
    %11 = vector.broadcast %cst_8 : f32 to vector<16x128xf32>
    %12 = arith.cmpf ogt, %10, %11 : vector<16x128xf32>
    %cst_9 = arith.constant 2.000000e-01 : f32
    %13 = vector.broadcast %cst_9 : f32 to vector<16x128xf32>
    %14 = arith.mulf %13, %10 : vector<16x128xf32>
    %15 = arith.select %12, %10, %14 : vector<16x128xi1>, vector<16x128xf32>
    %16 = arith.mulf %15, %15 : vector<16x128xf32>
    %cst_10 = arith.constant dense<0.000000e+00> : vector<16xf32>
    %17 = vector.multi_reduction <add>, %16, %cst_10 [1] : vector<16x128xf32> to vector<16xf32>
    %18 = vector.shape_cast %17 : vector<16xf32> to vector<16x1xf32>
    %cst_11 = arith.constant 1.000000e-24 : f32
    %19 = vector.broadcast %cst_11 : f32 to vector<16x1xf32>
    %20 = arith.maximumf %18, %19 : vector<16x1xf32>
    %21 = math.rsqrt %20 : vector<16x1xf32>
    %22 = vector.broadcast %21 : vector<16x1xf32> to vector<16x128xf32>
    %23 = arith.mulf %15, %22 : vector<16x128xf32>
    %24 = tpu.iota {dimensions = array<i32: 0>} : vector<3x16xi32>
    %25 = tpu.iota {dimensions = array<i32: 1>} : vector<3x16xi32>
    %c0_i32 = arith.constant 0 : i32
    %26 = vector.broadcast %c0_i32 : i32 to vector<3x16xi32>
    %c0_i32_12 = arith.constant 0 : i32
    %27 = vector.broadcast %c0_i32_12 : i32 to vector<3x16xi32>
    %28 = arith.cmpi eq, %24, %27 : vector<3x16xi32>
    %c0_13 = arith.constant 0 : index
    %29 = memref.load %arg0[%c0_13] : memref<3xi32, #tpu.memory_space<smem>>
    %30 = vector.broadcast %29 : i32 to vector<3x16xi32>
    %31 = arith.select %28, %30, %26 : vector<3x16xi1>, vector<3x16xi32>
    %c1_i32 = arith.constant 1 : i32
    %32 = vector.broadcast %c1_i32 : i32 to vector<3x16xi32>
    %33 = arith.cmpi eq, %24, %32 : vector<3x16xi32>
    %c1 = arith.constant 1 : index
    %34 = memref.load %arg0[%c1] : memref<3xi32, #tpu.memory_space<smem>>
    %35 = vector.broadcast %34 : i32 to vector<3x16xi32>
    %36 = arith.select %33, %35, %31 : vector<3x16xi1>, vector<3x16xi32>
    %c2_i32 = arith.constant 2 : i32
    %37 = vector.broadcast %c2_i32 : i32 to vector<3x16xi32>
    %38 = arith.cmpi eq, %24, %37 : vector<3x16xi32>
    %c2 = arith.constant 2 : index
    %39 = memref.load %arg0[%c2] : memref<3xi32, #tpu.memory_space<smem>>
    %40 = vector.broadcast %39 : i32 to vector<3x16xi32>
    %41 = arith.select %38, %40, %36 : vector<3x16xi1>, vector<3x16xi32>
    %42 = arith.cmpi eq, %25, %41 : vector<3x16xi32>
    %cst_14 = arith.constant 1.000000e+00 : f32
    %cst_15 = arith.constant 0.000000e+00 : f32
    %43 = vector.broadcast %cst_14 : f32 to vector<3x16xf32>
    %44 = vector.broadcast %cst_15 : f32 to vector<3x16xf32>
    %45 = arith.select %42, %43, %44 : vector<3x16xi1>, vector<3x16xf32>
    %46 = arith.truncf %45 : vector<3x16xf32> to vector<3x16xbf16>
    %c0_16 = arith.constant 0 : index
    %c0_17 = arith.constant 0 : index
    %47 = vector.load %arg1[%c0_16, %c0_17] : memref<16x16xbf16, #tpu.memory_space<vmem>>, vector<16x16xbf16>
    %cst_18 = arith.constant dense<0.000000e+00> : vector<3x16xf32>
    %48 = tpu.matmul %46, %47, %cst_18 {dimension_numbers = #tpu.dot_dimension_numbers<[1], [0], [0], [1], [0, 0, 1, 1], [], []>} : vector<3x16xbf16>, vector<16x16xbf16>, vector<3x16xf32> -> vector<3x16xf32>
    %49 = arith.truncf %48 : vector<3x16xf32> to vector<3x16xbf16>
    %50 = arith.truncf %23 : vector<16x128xf32> to vector<16x128xbf16>
    %cst_19 = arith.constant dense<0.000000e+00> : vector<3x128xf32>
    %51 = tpu.matmul %49, %50, %cst_19 {dimension_numbers = #tpu.dot_dimension_numbers<[1], [0], [0], [1], [0, 0, 1, 1], [], []>} : vector<3x16xbf16>, vector<16x128xbf16>, vector<3x128xf32> -> vector<3x128xf32>
    %52 = arith.truncf %51 : vector<3x128xf32> to vector<3x128xbf16>
    %c0_20 = arith.constant 0 : index
    %c0_21 = arith.constant 0 : index
    %53 = vector.load %arg5[%c0_20, %c0_21] : memref<128x128xbf16, #tpu.memory_space<vmem>>, vector<128x128xbf16>
    %cst_22 = arith.constant dense<0.000000e+00> : vector<3x128xf32>
    %54 = tpu.matmul %52, %53, %cst_22 {dimension_numbers = #tpu.dot_dimension_numbers<[1], [0], [0], [1], [0, 0, 1, 1], [], []>} : vector<3x128xbf16>, vector<128x128xbf16>, vector<3x128xf32> -> vector<3x128xf32>
    %55 = vector.broadcast %2 : vector<1x128xf32> to vector<3x128xf32>
    %56 = arith.addf %54, %55 : vector<3x128xf32>
    %cst_23 = arith.constant 0.000000e+00 : f32
    %57 = vector.broadcast %cst_23 : f32 to vector<3x128xf32>
    %58 = arith.cmpf ogt, %56, %57 : vector<3x128xf32>
    %cst_24 = arith.constant 2.000000e-01 : f32
    %59 = vector.broadcast %cst_24 : f32 to vector<3x128xf32>
    %60 = arith.mulf %59, %56 : vector<3x128xf32>
    %61 = arith.select %58, %56, %60 : vector<3x128xi1>, vector<3x128xf32>
    %62 = arith.mulf %61, %61 : vector<3x128xf32>
    %cst_25 = arith.constant dense<0.000000e+00> : vector<3xf32>
    %63 = vector.multi_reduction <add>, %62, %cst_25 [1] : vector<3x128xf32> to vector<3xf32>
    %64 = vector.shape_cast %63 : vector<3xf32> to vector<3x1xf32>
    %cst_26 = arith.constant 1.000000e-24 : f32
    %65 = vector.broadcast %cst_26 : f32 to vector<3x1xf32>
    %66 = arith.maximumf %64, %65 : vector<3x1xf32>
    %67 = math.rsqrt %66 : vector<3x1xf32>
    %68 = vector.broadcast %67 : vector<3x1xf32> to vector<3x128xf32>
    %69 = arith.mulf %61, %68 : vector<3x128xf32>
    %c0_27 = arith.constant 0 : index
    %c0_28 = arith.constant 0 : index
    %70 = vector.load %arg6[%c0_27, %c0_28] : memref<3x128xf32, #tpu.memory_space<vmem>>, vector<3x128xf32>
    tpu.vector_store %arg6[%c0_27, %c0_28], %69 {strides = array<i32>} : memref<3x128xf32, #tpu.memory_space<vmem>>, vector<3x128xf32>,
    return
  }
}

</mosaic_0001>

<bundles_post_ra>
// kernel: sgcn_forward.1
= control target key start
LH: loop header
LB: loop body
LE: loop exit
PB: predicated region body
PF: predicated region fallthrough
CT: control target
= control target key end

     0   :  { %11 = vsyncpa [#allocation5], 0  ;;  %s1011_s0 = inlined_call_operand.vmem [shape: s32[3], index: 0, kind: input, shape index: {}]   ;;  %s1012_s1 = inlined_call_operand.hbm [shape: bf16[16,16], index: 1, kind: input, shape index: {}]   ;;  %s1013_s2 = inlined_call_operand.hbm [shape: bf16[16,384], index: 2, kind: input, shape index: {}]   ;;  %s1014_s3 = inlined_call_operand.hbm [shape: bf16[384,128], index: 3, kind: input, shape index: {}]   ;;  %s1015_s4 = inlined_call_operand.vmem [shape: f32[2,128], index: 4, kind: input, shape index: {}]   ;;  %s1016_s5 = inlined_call_operand.hbm [shape: bf16[128,128], index: 5, kind: input, shape index: {}]   ;;  %s1017_s6 = inlined_call_operand.hbm [shape: f32[3,128], index: 6, kind: output, shape index: {}]  }
   0x1   :  { %12 = vsyncpa [#allocation3], 0 }
   0x2   :  { %13 = vsyncpa [#allocation8], 0 }
   0x3   :  { %14 = vsyncpa [#allocation11], 0  ;;  %s42_s23 = sshll.u32 %s1013_s2, 4  ;;  %s43_s23 = int_to_ptr.hbm [resolvable:$true] %s42_s23 }
   0x4   :  { %15 = vsyncpa [#allocation4], 0  ;;  %s937_s24 = smov [#allocation7]   ;;  %s21_s28 = sshll.u32 %s1011_s0, 4  ;;  %s22_s28 = int_to_ptr.vmem [resolvable:$true] %s21_s28 }
   0x5   :  { %s44_s25 = sshll.u32 %s937_s24, 4  ;;  %s938_s29 = smov 192   ;;  %s45_s25 = int_to_ptr.vmem [resolvable:$true] %s44_s25 }
   0x6   :  { %s939_s30 = smov 12   ;;  %s940_s7 = smov [#allocation2]  }
   0x7   :  { %50 = dma.hbm_to_vmem [thread:$0]  %s43_s23, 384, %s45_s25, [#allocation8], %s938_s29, %s938_s29, %s939_s30  }
   0x8   :  { %24 = dma.vmem_to_smem %s22_s28, 16, %s940_s7, [#allocation5]  }
   0x9   :  { %s29_s10 = sshll.u32 %s1012_s1, 4  ;;  %s941_s2 = smov [#allocation6]   ;;  %s30_s10 = int_to_ptr.hbm [resolvable:$true] %s29_s10 }
   0xa   :  { %s31_s11 = sshll.u32 %s941_s2, 4  ;;  %s55_s14 = sshll.u32 %s1014_s3, 4  ;;  %s32_s11 = int_to_ptr.vmem [resolvable:$true] %s31_s11  ;;  %s56_s14 = int_to_ptr.hbm [resolvable:$true] %s55_s14 }
   0xb   :  { %s942_s15 = smov 64   ;;  %s943_s0 = smov 4  }
   0xc   :  { %37 = dma.hbm_to_vmem [thread:$0]  %s30_s10, 128, %s32_s11, [#allocation3], %s942_s15, %s942_s15, %s943_s0  }
   0xd   :  { %s944_s16 = smov [#allocation9]   ;;  %s70_s20 = sshll.u32 %s1016_s5, 4  ;;  %s71_s20 = int_to_ptr.hbm [resolvable:$true] %s70_s20 }
   0xe   :  { %s57_s17 = sshll.u32 %s944_s16, 4  ;;  %s945_s1 = smov [#allocation10]   ;;  %s58_s17 = int_to_ptr.vmem [resolvable:$true] %s57_s17 }
   0xf   :  { %63 = dma.hbm_to_vmem [thread:$0]  %s56_s14, 3072, %s58_s17, [#allocation8], %s942_s15, %s942_s15, %s943_s0  }
  0x10   :  { %s72_s21 = sshll.u32 %s945_s1, 4  ;;  %s73_s21 = int_to_ptr.vmem [resolvable:$true] %s72_s21 }
  0x11   :  { %78 = dma.hbm_to_vmem [thread:$0]  %s71_s20, 1024, %s73_s21, [#allocation11], %s942_s15, %s942_s15, %s943_s0  }
  0x12   :  { %927 = dma.done.wait [#allocation5], 16  }
  0x13   :  { %928 = vsyncadd [#allocation5], 4294967280 }
  0x14   :  { %929 = dma.done.wait [#allocation3], 128  }
  0x15   :  { %930 = vsyncadd [#allocation3], 4294967168 }
  0x16   :  { %931 = dma.done.wait [#allocation8], 3456  }
  0x17   :  { %932 = vsyncadd [#allocation8], 4294963840 }
  0x18   :  { %933 = dma.done.wait [#allocation11], 1024  }
  0x19   :  { %934 = vsyncadd [#allocation11], 4294966272 }
  0x1a   :  { %99 = sfence }
  0x1b   :  { %v752_v0 = vld [vmem:[#allocation9 + $0x38] sm:$0xff]  ;;  %v751_v3 = vld [vmem:[#allocation9 + $0x30] sm:$0xff]  ;;  %v750_v6 = vld [vmem:[#allocation9 + $0x28] sm:$0xff]  ;;  %vm365_vm0 = vcmask 130048   ;;  %s424_s3 = sld [smem:[#allocation2]]  ;;  %v419_v45 = vlaneseq  ;;  %v946_v54 = vmov 0.0  }
  0x1c   :  { %v760_v1 = vld [vmem:[#allocation9 + $0x78] sm:$0xff]  ;;  %314 = vmatpush.bf16.msra.mxu0 %v752_v0  ;;  %v759_v4 = vld [vmem:[#allocation9 + $0x70] sm:$0xff]  ;;  %v758_v7 = vld [vmem:[#allocation9 + $0x68] sm:$0xff]  ;;  %s706_s5 = sld [smem:[#allocation2 + $0x1]]  ;;  %vm556_vm14 = vcmask 1042432   ;;  %s580_s28 = sshll.u32 %s1017_s6, 4  ;;  %s581_s28 = int_to_ptr.hbm [resolvable:$true] %s580_s28 }
  0x1d   :  { %v768_v2 = vld [vmem:[#allocation9 + $0xb8] sm:$0xff]  ;;  %328 = vmatpush.bf16.msra.mxu1 %v760_v1  ;;  %v767_v5 = vld [vmem:[#allocation9 + $0xb0] sm:$0xff]  ;;  %v766_v8 = vld [vmem:[#allocation9 + $0xa8] sm:$0xff]  ;;  %s707_s22 = sld [smem:[#allocation2 + $0x2]]  ;;  %v420_v46 = vshrl.u32 %v419_v45, 7  ;;  %v422_v50 = vand.u32 127, %v419_v45 }
  0x1e   :  { %342 = vmatpush.bf16.msra.mxu2 %v768_v2  ;;  %v749_v9 = vld [vmem:[#allocation9 + $0x20] sm:$0xff]  ;;  %v748_v12 = vld [vmem:[#allocation9 + $0x18] sm:$0xff]  ;;  %v747_v15 = vld [vmem:[#allocation9 + $0x10] sm:$0xff] }
  0x1f   :  { %v757_v10 = vld [vmem:[#allocation9 + $0x60] sm:$0xff]  ;;  %v756_v13 = vld [vmem:[#allocation9 + $0x58] sm:$0xff]  ;;  %v755_v16 = vld [vmem:[#allocation9 + $0x50] sm:$0xff]  ;;  %vm423_vm1 = vcmp.eq.s32.totalorder %v420_v46, 0  ;;  %vm427_vm2 = vcmp.eq.s32.totalorder %v420_v46, 1  ;;  %vm431_vm3 = vcmp.eq.s32.totalorder %v420_v46, 2 }
  0x20   :  { %315 = vmatpush.bf16.msra.mxu0 %v751_v3  ;;  %v765_v11 = vld [vmem:[#allocation9 + $0xa0] sm:$0xff]  ;;  %v764_v14 = vld [vmem:[#allocation9 + $0x98] sm:$0xff]  ;;  %v763_v17 = vld [vmem:[#allocation9 + $0x90] sm:$0xff] }
  0x21   :  { %329 = vmatpush.bf16.msra.mxu1 %v759_v4  ;;  %v746_v18 = vld [vmem:[#allocation9 + $0x8] sm:$0xff]  ;;  %v745_v21 = vld [vmem:[#allocation9] sm:$0xff]  ;;  %v743_v24 = vld [vmem:[#allocation7 + $0x8] sm:$0xf0]  ;;  %v425_v47 = vstv %s424_s3 }
  0x22   :  { %343 = vmatpush.bf16.msra.mxu2 %v767_v5  ;;  %v754_v19 = vld [vmem:[#allocation9 + $0x48] sm:$0xff]  ;;  %v753_v22 = vld [vmem:[#allocation9 + $0x40] sm:$0xff]  ;;  %v597_v26 = vld [vmem:[#allocation7 + $0xc] sm:$0xf0]  ;;  %v426_v48 = vsel %vm423_vm1, %v425_v47, 0  ;;  %v429_v49 = vstv %s706_s5 }
  0x23   :  { %v762_v20 = vld [vmem:[#allocation9 + $0x88] sm:$0xff]  ;;  %v761_v27 = vld [vmem:[#allocation9 + $0x80] sm:$0xff]  ;;  %v603_v28 = vld [vmem:[#allocation7 + $0x8] sm:$0xf]  ;;  %v430_v51 = vsel %vm427_vm2, %v429_v49, %v426_v48  ;;  %v433_v52 = vstv %s707_s22 }
  0x24   :  { %316 = vmatpush.bf16.msra.mxu0 %v750_v6  ;;  %v595_v23 = vld [vmem:[#allocation7] sm:$0xf]  ;;  %v742_v25 = vld [vmem:[#allocation7 + $0x4] sm:$0xf]  ;;  %v744_v29 = vld [vmem:[#allocation7 + $0x10] sm:$0xf0]  ;;  %v434_v53 = vsel %vm431_vm3, %v433_v52, %v430_v51 }
  0x25   :  { %330 = vmatpush.bf16.msra.mxu1 %v758_v7  ;;  %v596_v30 = vor.u32 %v743_v24, %v595_v23  ;;  %v600_v31 = vor.u32 %v742_v25, %v597_v26  ;;  %v604_v32 = vor.u32 %v744_v29, %v603_v28  ;;  %v769_v44 = vld [vmem:[#allocation6] sm:$0xff]  ;;  %vm435_vm4 = vcmp.eq.s32.totalorder %v422_v50, %v434_v53  ;;  %v772_v26 = vld [vmem:[#allocation10 + $0x10] sm:$0xff] }
  0x26   :  { %344 = vmatpush.bf16.msra.mxu2 %v766_v8  ;;  %v436_v55 = vsel %vm435_vm4, 1.0, %v946_v54  ;;  %v1003_v57 = vld [vmem:[%s1015_s4] sm:$0x3]  ;;  %s947_s4 = smov [#allocation12]  }
  0x27   :  { %v437_v56 = vpack.c.bf16 %v436_v55, %v436_v55  ;;  %v359_v58 = vperm.slane %v1003_v57, 0  ;;  %s578_s25 = sshll.u32 %s947_s4, 4  ;;  %s579_s25 = int_to_ptr.vmem [resolvable:$true] %s578_s25 }
  0x28   :  { %317 = vmatpush.bf16.msra.mxu0 %v749_v9  ;;  %v777_v9 = vld [vmem:[#allocation10 + $0x38] sm:$0xff] }
  0x29   :  { %331 = vmatpush.bf16.msra.mxu1 %v757_v10  ;;  %v776_v10 = vld [vmem:[#allocation10 + $0x30] sm:$0xff] }
  0x2a   :  { %345 = vmatpush.bf16.msra.mxu2 %v765_v11 }
  0x2c   :  { %318 = vmatpush.bf16.msra.mxu0 %v748_v12 }
  0x2d   :  { %332 = vmatpush.bf16.msra.mxu1 %v756_v13 }
  0x2e   :  { %346 = vmatpush.bf16.msra.mxu2 %v764_v14 }
  0x30   :  { %319 = vmatpush.bf16.msra.mxu0 %v747_v15  ;;  %v775_v15 = vld [vmem:[#allocation10 + $0x28] sm:$0xff] }
  0x31   :  { %333 = vmatpush.bf16.msra.mxu1 %v755_v16 }
  0x32   :  { %347 = vmatpush.bf16.msra.mxu2 %v763_v17 }
  0x34   :  { %320 = vmatpush.bf16.msra.mxu0 %v746_v18  ;;  %v774_v18 = vld [vmem:[#allocation10 + $0x20] sm:$0xff] }
  0x35   :  { %334 = vmatpush.bf16.msra.mxu1 %v754_v19 }
  0x36   :  { %348 = vmatpush.bf16.msra.mxu2 %v762_v20 }
  0x38   :  { %321 = vmatpush.bf16.msra.mxu0 %v745_v21 }
  0x39   :  { %335 = vmatpush.bf16.msra.mxu1 %v753_v22  ;;  %v773_v22 = vld [vmem:[#allocation10 + $0x18] sm:$0xff] }
  0x3a   :  { %349 = vmatpush.bf16.msra.mxu2 %v761_v27 }
  0x3b   :  { %322 = vmatmul.bf16.vlgmr.msra.gmra.mxu0 %v596_v30  ;;  %v771_v30 = vld [vmem:[#allocation10 + $0x8] sm:$0xff] }
  0x3c   :  { %336 = vmatmul.bf16.vlgmr.msra.gmra.mxu1 %v600_v31  ;;  %539 = vmatpush.bf16.msrb.mxu0 %v777_v9 }
  0x3d   :  { %350 = vmatmul.bf16.vlgmr.msra.gmra.mxu2 %v604_v32 }
  0x40   :  { %540 = vmatpush.bf16.msrb.mxu0 %v776_v10 }
  0x44   :  { %541 = vmatpush.bf16.msrb.mxu0 %v775_v15 }
  0x48   :  { %542 = vmatpush.bf16.msrb.mxu0 %v774_v18 }
  0x4c   :  { %543 = vmatpush.bf16.msrb.mxu0 %v773_v22 }
  0x50   :  { %544 = vmatpush.bf16.msrb.mxu0 %v772_v26 }
  0x54   :  { %545 = vmatpush.bf16.msrb.mxu0 %v771_v30 }
  0xb8   :  { %v323_v33 = vpop.f32.mrf.mxu0 }
  0xb9   :  { %v337_v34 = vpop.f32.mrf.mxu1 }
  0xba   :  { %v338_v38 = vadd.f32 %v337_v34, %v323_v33 }
  0xc0   :  { %v351_v35 = vpop.f32.mrf.mxu2  ;;  %v325_v36 = vpop.f32.mrf.mxu0 }
  0xc1   :  { %v339_v37 = vpop.f32.mrf.mxu1  ;;  %v352_v41 = vadd.f32 %v351_v35, %v338_v38 }
  0xc2   :  { %v340_v39 = vadd.f32 %v339_v37, %v325_v36  ;;  %v770_v36 = vld [vmem:[#allocation10] sm:$0xff] }
  0xc3   :  { %546 = vmatpush.bf16.msrb.mxu0 %v770_v36 }
  0xc8   :  { %v353_v40 = vpop.f32.mrf.mxu2 }
  0xc9   :  { %v354_v42 = vadd.f32 %v353_v40, %v340_v39  ;;  %v490_v40 = vperm.slane %v1003_v57, 1 }
  0xcb   :  { %v358_v43 = vpack.c.bf16 %v354_v42, %v352_v41 }
  0xcd   :  { %376 = vmatpush.bf16.msra.mxu3 %v358_v43 }
  0xd0   :  { %705 = vmatmul.msk.bf16.vlgmr.msra.gmra.mxu3 %vm365_vm0, %v769_v44 }
  0xd1   :  { %449 = vmatpush.bf16.msrb.mxu3 %v769_v44 }
  0xe0   :  { %708 = vmatmul.msk.bf16.vlgmr.msrb.gmra.mxu3 %vm365_vm0, %v437_v56 }
 0x153   :  { %v378_v59 = vpop.f32.mrf.mxu3 }
 0x154   :  { %v379_v60 = vadd.f32 %v378_v59, %v359_v58 }
 0x156   :  { %v385_v61 = vmul.f32 0.2, %v379_v60  ;;  %vm383_vm5 = vcmp.gt.f32.partialorder %v379_v60, 0.0 }
 0x158   :  { %v387_v62 = vsel %vm383_vm5, %v379_v60, %v385_v61 }
 0x159   :  { %v389_v63 = vmul.f32 %v387_v62, %v387_v62 }
 0x15b   :  { %v380_v0 = vpop.f32.mrf.mxu3  ;;  %391 = vadd.xlane.f32.xlu0 %v389_v63 }
 0x15c   :  { %v381_v1 = vadd.f32 %v380_v0, %v359_v58 }
 0x15e   :  { %v386_v2 = vmul.f32 0.2, %v381_v1  ;;  %vm384_vm6 = vcmp.gt.f32.partialorder %v381_v1, 0.0 }
 0x160   :  { %v388_v3 = vsel %vm384_vm6, %v381_v1, %v386_v2 }
 0x161   :  { %v390_v4 = vmul.f32 %v388_v3, %v388_v3 }
 0x163   :  { %393 = vadd.xlane.f32.xlu0 %v390_v4  ;;  %v451_v5 = vpop.f32.mrf.mxu3 }
 0x164   :  { %v455_v35 = vpack.c.bf16 %v451_v5, %v451_v5 }
 0x16b   :  { %v453_v8 = vpop.f32.mrf.mxu3 }
 0x1ce   :  { %v392_v6 = vpop.xlane.xlu0 %391 }
 0x1cf   :  { %v395_v7 = vmax.f32 %v392_v6, 1e-24 }
 0x1d1   :  { %789 = vrsqrt.f32 %v395_v7  ;;  %vm403_vm8 = vweird.f32 %v395_v7 }
 0x1d6   :  { %v394_v11 = vpop.xlane.xlu0 %393 }
 0x1d7   :  { %v790_v12 = vpop.eup %789  ;;  %v396_v13 = vmax.f32 %v394_v11, 1e-24 }
 0x1d8   :  { %v398_v14 = vmul.f32 %v790_v12, %v395_v7  ;;  %vm404_vm7 = vweird.f32 %v790_v12 }
 0x1d9   :  { %791 = vrsqrt.f32 %v396_v13  ;;  %vm405_vm10 = vmor %vm403_vm8, %vm404_vm7  ;;  %vm413_vm11 = vweird.f32 %v396_v13 }
 0x1da   :  { %v399_v16 = vmul.f32 %v790_v12, %v398_v14 }
 0x1dc   :  { %v400_v17 = vmul.f32 0.5, %v399_v16 }
 0x1de   :  { %v401_v20 = vsub.f32 1.5, %v400_v17 }
 0x1df   :  { %v792_v19 = vpop.eup %791 }
 0x1e0   :  { %v408_v21 = vmul.f32 %v792_v19, %v396_v13  ;;  %v402_v24 = vmul.f32 %v790_v12, %v401_v20  ;;  %vm414_vm9 = vweird.f32 %v792_v19 }
 0x1e1   :  { %vm415_vm12 = vmor %vm413_vm11, %vm414_vm9 }
 0x1e2   :  { %v409_v23 = vmul.f32 %v792_v19, %v408_v21  ;;  %v406_v28 = vsel %vm405_vm10, %v790_v12, %v402_v24 }
 0x1e3   :  { %v417_v32 = vmul.f32 %v406_v28, %v387_v62 }
 0x1e4   :  { %v410_v25 = vmul.f32 0.5, %v409_v23 }
 0x1e6   :  { %v411_v27 = vsub.f32 1.5, %v410_v25 }
 0x1e8   :  { %v412_v29 = vmul.f32 %v792_v19, %v411_v27 }
 0x1ea   :  { %v416_v31 = vsel %vm415_vm12, %v792_v19, %v412_v29 }
 0x1eb   :  { %v418_v33 = vmul.f32 %v416_v31, %v388_v3 }
 0x1ed   :  { %v456_v34 = vpack.c.bf16 %v418_v33, %v417_v32 }
 0x1ef   :  { %467 = vmatpush.bf16.msra.mxu3 %v456_v34 }
 0x1f2   :  { %709 = vmatmul.msk.bf16.vlgmr.msra.gmra.mxu3 %vm365_vm0, %v455_v35 }
 0x275   :  { %v469_v37 = vpop.f32.mrf.mxu3 }
 0x276   :  { %v473_v38 = vpack.c.bf16 %v469_v37, %v469_v37 }
 0x278   :  { %547 = vmatmul.bf16.vlgmr.msrb.gmra.mxu0 %v473_v38 }
 0x27d   :  { %v471_v39 = vpop.f32.mrf.mxu3 }
 0x2f5   :  { %v548_v41 = vpop.f32.mrf.mxu0 }
 0x2f6   :  { %v549_v42 = vadd.f32 %v548_v41, %v490_v40 }
 0x2f8   :  { %v553_v43 = vmul.f32 0.2, %v549_v42  ;;  %vm552_vm13 = vcmp.gt.f32.partialorder %v549_v42, 0.0 }
 0x2fa   :  { %v554_v44 = vsel %vm552_vm13, %v549_v42, %v553_v43 }
 0x2fb   :  { %v555_v45 = vmul.f32 %v554_v44, %v554_v44 }
 0x2fd   :  { %v557_v46 = vsel %vm556_vm14, %v555_v45, 0.0  ;;  %v550_v47 = vpop.f32.mrf.mxu0 }
 0x2fe   :  { %558 = vadd.xlane.f32.xlu1 %v557_v46 }
 0x371   :  { %v559_v48 = vpop.xlane.xlu1 %558 }
 0x372   :  { %v560_v49 = vmax.f32 %v559_v48, 1e-24 }
 0x374   :  { %793 = vrsqrt.f32 %v560_v49  ;;  %vm567_vm0 = vweird.f32 %v560_v49 }
 0x37a   :  { %v794_v50 = vpop.eup %793 }
 0x37b   :  { %v562_v51 = vmul.f32 %v794_v50, %v560_v49  ;;  %vm568_vm15 = vweird.f32 %v794_v50 }
 0x37c   :  { %vm569_vm1 = vmor %vm567_vm0, %vm568_vm15 }
 0x37d   :  { %v563_v52 = vmul.f32 %v794_v50, %v562_v51 }
 0x37f   :  { %v564_v53 = vmul.f32 0.5, %v563_v52 }
 0x381   :  { %v565_v54 = vsub.f32 1.5, %v564_v53 }
 0x383   :  { %v566_v55 = vmul.f32 %v794_v50, %v565_v54 }
 0x385   :  { %v570_v56 = vsel %vm569_vm1, %v794_v50, %v566_v55 }
 0x386   :  { %v571_v57 = vmul.f32 %v570_v56, %v554_v44 }
 0x388   :  { %572 = vst [vmem:[#allocation12] sm:$0x7] %v571_v57 }
 0x389   :  { %583 = dma.vmem_to_hbm [thread:$0]  %s579_s25, 64, %s581_s28, [#allocation4]  }
 0x38a   :  { %935 = dma.done.wait [#allocation4], 64  }
 0x38b   :  { %936 = vsyncadd [#allocation4], 4294967232 }
 0x38c   :  { %588 = vsyncpa [#allocation3], 1 }
 0x38d   :  { %589 = vsyncpa [#allocation8], 1 }
 0x38e   :  { %590 = vsyncpa [#allocation11], 1 }
 0x38f   :  { %591 = vsyncpa [#allocation4], 1 }
 0x390   :  { %592 = vsyncpa [#allocation5], 1 }

</bundles_post_ra>
